<compile_context>
chip_gen: v7x
topology: tpu7x:2x2x1
jax: 0.10.0
libtpu: 0.0.40
codegen_flags: <defaults>
</compile_context>

<pallas_src>
import functools

import jax
import jax.numpy as jnp
from jax.experimental import pallas as pl
from jax.experimental.pallas import tpu as pltpu

_LANE = 128


def _nwf_kernel(c_ref, ninv2s2_ref, w_ref, x_ref, o_ref, *, ncenter):
    """One grid step: a (tile_rows, 128) slab of positions vs all K centers.

    c_ref:       (K,)  SMEM  rbf centers
    ninv2s2_ref: (K,)  SMEM  -1 / (2 * sigma_j^2)  (negated, precomputed)
    w_ref:       (K,)  SMEM  fc weight row (nn.Linear(K, 1, bias=False).weight)
    x_ref:       (tile_rows, 128) VMEM positions (lane-dense)
    o_ref:       (tile_rows, 128) VMEM psi values
    """
    x = x_ref[...]                                   # (TR, 128) f32

    # Center 0 initializes the accumulator (saves a zero splat + one add).
    d = x - c_ref[0]
    acc = w_ref[0] * jnp.exp((d * d) * ninv2s2_ref[0])

    # K is static -> fully unrolled; each iteration is 5 VALU ops + 1 EUP exp,
    # with per-center constants coming off the scalar path (SMEM).
    for j in range(1, ncenter):
        d = x - c_ref[j]
        acc = acc + w_ref[j] * jnp.exp((d * d) * ninv2s2_ref[j])

    o_ref[...] = acc.astype(o_ref.dtype)


def neural_wave_function_forward(pos, centers, sigma, fc_weight, *, tile_rows=2048):
    """psi(pos) for the NeuralWaveFunction module.

    pos:       any shape, flattened like x.view(-1, 1)
    centers:   (K, 1)  (as stored by the module: linspace(...).view(-1, 1))
    sigma:     (K,)
    fc_weight: (1, K)
    returns:   (N, 1) float32
    """
    x_flat = pos.reshape(-1).astype(jnp.float32)
    n = x_flat.shape[0]
    k = centers.shape[0]

    # ---- lane-dense layout: batch -> (rows8, 128), rows8 multiple of 8 ----
    n_rows = pl.cdiv(n, _LANE)
    rows8 = max(8, ((n_rows + 7) // 8) * 8)
    n_pad = rows8 * _LANE
    if n_pad != n:                                   # skip extra HBM pass when aligned
        x_flat = jnp.pad(x_flat, (0, n_pad - n))     # padded lanes -> harmless exp()
    x2d = x_flat.reshape(rows8, _LANE)

    # ---- tile sizing: big tiles, bounded padding, >=2 grid steps if possible
    tile_rows = max(8, (int(tile_rows) // 8) * 8)
    tile_rows = min(tile_rows, rows8)
    if rows8 >= 16:
        # Cap so the grid has at least 2 steps -> both TCs busy on v7x
        # (dimension_semantics=("parallel",) shards the grid axis).
        half = ((rows8 + 15) // 16) * 8              # ceil(rows8/2) rounded up to 8
        tile_rows = min(tile_rows, half)
    grid = (pl.cdiv(rows8, tile_rows),)              # last block may be partial (masked)

    # ---- K-sized parameters: precompute + park in SMEM -------------------
    c_1d = centers.reshape(k).astype(jnp.float32)
    s_1d = sigma.reshape(k).astype(jnp.float32)
    neg_inv2s2 = -0.5 / (s_1d * s_1d)                # negation folded into constant
    w_1d = fc_weight.reshape(k).astype(jnp.float32)

    smem_spec = pl.BlockSpec(memory_space=pltpu.MemorySpace.SMEM)

    out = pl.pallas_call(
        functools.partial(_nwf_kernel, ncenter=k),
        out_shape=jax.ShapeDtypeStruct((rows8, _LANE), jnp.float32),
        grid_spec=pltpu.PrefetchScalarGridSpec(
            num_scalar_prefetch=0,
            grid=grid,
            in_specs=[
                smem_spec,                                           # centers (K,)
                smem_spec,                                           # -1/(2 sigma^2) (K,)
                smem_spec,                                           # fc weights (K,)
                pl.BlockSpec((tile_rows, _LANE), lambda i: (i, 0)),  # positions
            ],
            out_specs=pl.BlockSpec((tile_rows, _LANE), lambda i: (i, 0)),
        ),
        compiler_params=pltpu.CompilerParams(
            dimension_semantics=("parallel",)),
    )(c_1d, neg_inv2s2, w_1d, x2d)

    out_flat = out.reshape(-1)
    if n_pad != n:
        out_flat = out_flat[:n]
    return out_flat.reshape(n, 1)


def _reference_forward(pos, centers, sigma, fc_weight):
    x = pos.reshape(-1, 1).astype(jnp.float32)
    c = centers.reshape(1, -1)
    s = sigma.reshape(1, -1)
    phi = jnp.exp(-((x - c) ** 2) / (2.0 * s * s))
    return phi @ fc_weight.reshape(-1, 1)


def make_params(xmin, xmax, ncenter, fcinit=0.1, sigma=1.0):
    """Deterministic parameter init matching NeuralWaveFunction.__init__."""
    centers = jnp.linspace(xmin, xmax, ncenter).reshape(-1, 1)      # (K, 1)
    sigmas = sigma * jnp.ones((ncenter,), jnp.float32)              # (K,)
    w = jnp.full((1, ncenter), fcinit, jnp.float32)                 # fc weight
    w = w.at[0, ncenter // 2].set(1.0)
    return centers, sigmas, w


if __name__ == "__main__":
    key = jax.random.PRNGKey(0)

    xmin, xmax = -5.0, 5.0
    ncenter = 16
    centers, sigmas, fc_w = make_params(xmin, xmax, ncenter,
                                        fcinit=0.1, sigma=1.0)

    k1, k2, k3 = jax.random.split(key, 3)

    # small check: 64 walkers (single padded 8x128 slab, one grid step)
    pos_small = jax.random.uniform(k1, (64, 1), jnp.float32,
                                   minval=xmin, maxval=xmax)
    psi_small = jax.block_until_ready(
        neural_wave_function_forward(pos_small, centers, sigmas, fc_w))
    ref_small = _reference_forward(pos_small, centers, sigmas, fc_w)
    assert psi_small.shape == (64, 1)
    assert jnp.allclose(psi_small, ref_small, atol=1e-5, rtol=1e-5), \
        "mismatch vs reference (N=64)"

    # non-multiple N with a forced small tile -> multi-step grid + partial tail block
    pos_big = jax.random.uniform(k2, (3000,), jnp.float32,
                                 minval=xmin, maxval=xmax)
    psi_big = jax.block_until_ready(
        neural_wave_function_forward(pos_big, centers, sigmas, fc_w,
                                     tile_rows=8))
    ref_big = _reference_forward(pos_big, centers, sigmas, fc_w)
    assert psi_big.shape == (3000, 1)
    assert jnp.allclose(psi_big, ref_big, atol=1e-5, rtol=1e-5), \
        "mismatch vs reference (N=3000)"

    # aligned N (multiple of 8*128): no wrapper pad / slice, default tile sizing
    pos_al = jax.random.uniform(k3, (2048, 1), jnp.float32,
                                minval=xmin, maxval=xmax)
    psi_al = jax.block_until_ready(
        neural_wave_function_forward(pos_al, centers, sigmas, fc_w))
    ref_al = _reference_forward(pos_al, centers, sigmas, fc_w)
    assert psi_al.shape == (2048, 1)
    assert jnp.allclose(psi_al, ref_al, atol=1e-5, rtol=1e-5), \
        "mismatch vs reference (N=2048, aligned)"

    print("KERNEL_OK")
</pallas_src>

<mosaic_0001>
module attributes {stable_mosaic.version = 11 : i64} {
  func.func @_nwf_kernel(%arg0: i32, %arg1: memref<16xf32, #tpu.memory_space<smem>>, %arg2: memref<16xf32, #tpu.memory_space<smem>>, %arg3: memref<16xf32, #tpu.memory_space<smem>>, %arg4: memref<8x128xf32, #tpu.memory_space<vmem>>, %arg5: memref<8x128xf32, #tpu.memory_space<vmem>>) attributes {dimension_semantics = [#tpu.dimension_semantics<parallel>], iteration_bounds = array<i64: 1>, scalar_prefetch = 0 : i64, scratch_operands = 0 : i64, tpu.core_type = #tpu.core_type<tc>, window_params = [{transform_indices = @transform_0, window_bounds = array<i64: 16>}, {transform_indices = @transform_1, window_bounds = array<i64: 16>}, {transform_indices = @transform_2, window_bounds = array<i64: 16>}, {transform_indices = @transform_3, window_bounds = array<i64: 8, 128>}, {transform_indices = @transform_4, window_bounds = array<i64: 8, 128>}]} {
    %c0 = arith.constant 0 : index
    %c0_0 = arith.constant 0 : index
    %0 = vector.load %arg4[%c0, %c0_0] : memref<8x128xf32, #tpu.memory_space<vmem>>, vector<8x128xf32>
    %c0_1 = arith.constant 0 : index
    %1 = memref.load %arg1[%c0_1] : memref<16xf32, #tpu.memory_space<smem>>
    %2 = vector.broadcast %1 : f32 to vector<8x128xf32>
    %3 = arith.subf %0, %2 : vector<8x128xf32>
    %c0_2 = arith.constant 0 : index
    %4 = memref.load %arg3[%c0_2] : memref<16xf32, #tpu.memory_space<smem>>
    %5 = arith.mulf %3, %3 : vector<8x128xf32>
    %c0_3 = arith.constant 0 : index
    %6 = memref.load %arg2[%c0_3] : memref<16xf32, #tpu.memory_space<smem>>
    %7 = vector.broadcast %6 : f32 to vector<8x128xf32>
    %8 = arith.mulf %5, %7 : vector<8x128xf32>
    %9 = math.exp %8 : vector<8x128xf32>
    %10 = vector.broadcast %4 : f32 to vector<8x128xf32>
    %11 = arith.mulf %10, %9 : vector<8x128xf32>
    %c1 = arith.constant 1 : index
    %12 = memref.load %arg1[%c1] : memref<16xf32, #tpu.memory_space<smem>>
    %13 = vector.broadcast %12 : f32 to vector<8x128xf32>
    %14 = arith.subf %0, %13 : vector<8x128xf32>
    %c1_4 = arith.constant 1 : index
    %15 = memref.load %arg3[%c1_4] : memref<16xf32, #tpu.memory_space<smem>>
    %16 = arith.mulf %14, %14 : vector<8x128xf32>
    %c1_5 = arith.constant 1 : index
    %17 = memref.load %arg2[%c1_5] : memref<16xf32, #tpu.memory_space<smem>>
    %18 = vector.broadcast %17 : f32 to vector<8x128xf32>
    %19 = arith.mulf %16, %18 : vector<8x128xf32>
    %20 = math.exp %19 : vector<8x128xf32>
    %21 = vector.broadcast %15 : f32 to vector<8x128xf32>
    %22 = arith.mulf %21, %20 : vector<8x128xf32>
    %23 = arith.addf %11, %22 : vector<8x128xf32>
    %c2 = arith.constant 2 : index
    %24 = memref.load %arg1[%c2] : memref<16xf32, #tpu.memory_space<smem>>
    %25 = vector.broadcast %24 : f32 to vector<8x128xf32>
    %26 = arith.subf %0, %25 : vector<8x128xf32>
    %c2_6 = arith.constant 2 : index
    %27 = memref.load %arg3[%c2_6] : memref<16xf32, #tpu.memory_space<smem>>
    %28 = arith.mulf %26, %26 : vector<8x128xf32>
    %c2_7 = arith.constant 2 : index
    %29 = memref.load %arg2[%c2_7] : memref<16xf32, #tpu.memory_space<smem>>
    %30 = vector.broadcast %29 : f32 to vector<8x128xf32>
    %31 = arith.mulf %28, %30 : vector<8x128xf32>
    %32 = math.exp %31 : vector<8x128xf32>
    %33 = vector.broadcast %27 : f32 to vector<8x128xf32>
    %34 = arith.mulf %33, %32 : vector<8x128xf32>
    %35 = arith.addf %23, %34 : vector<8x128xf32>
    %c3 = arith.constant 3 : index
    %36 = memref.load %arg1[%c3] : memref<16xf32, #tpu.memory_space<smem>>
    %37 = vector.broadcast %36 : f32 to vector<8x128xf32>
    %38 = arith.subf %0, %37 : vector<8x128xf32>
    %c3_8 = arith.constant 3 : index
    %39 = memref.load %arg3[%c3_8] : memref<16xf32, #tpu.memory_space<smem>>
    %40 = arith.mulf %38, %38 : vector<8x128xf32>
    %c3_9 = arith.constant 3 : index
    %41 = memref.load %arg2[%c3_9] : memref<16xf32, #tpu.memory_space<smem>>
    %42 = vector.broadcast %41 : f32 to vector<8x128xf32>
    %43 = arith.mulf %40, %42 : vector<8x128xf32>
    %44 = math.exp %43 : vector<8x128xf32>
    %45 = vector.broadcast %39 : f32 to vector<8x128xf32>
    %46 = arith.mulf %45, %44 : vector<8x128xf32>
    %47 = arith.addf %35, %46 : vector<8x128xf32>
    %c4 = arith.constant 4 : index
    %48 = memref.load %arg1[%c4] : memref<16xf32, #tpu.memory_space<smem>>
    %49 = vector.broadcast %48 : f32 to vector<8x128xf32>
    %50 = arith.subf %0, %49 : vector<8x128xf32>
    %c4_10 = arith.constant 4 : index
    %51 = memref.load %arg3[%c4_10] : memref<16xf32, #tpu.memory_space<smem>>
    %52 = arith.mulf %50, %50 : vector<8x128xf32>
    %c4_11 = arith.constant 4 : index
    %53 = memref.load %arg2[%c4_11] : memref<16xf32, #tpu.memory_space<smem>>
    %54 = vector.broadcast %53 : f32 to vector<8x128xf32>
    %55 = arith.mulf %52, %54 : vector<8x128xf32>
    %56 = math.exp %55 : vector<8x128xf32>
    %57 = vector.broadcast %51 : f32 to vector<8x128xf32>
    %58 = arith.mulf %57, %56 : vector<8x128xf32>
    %59 = arith.addf %47, %58 : vector<8x128xf32>
    %c5 = arith.constant 5 : index
    %60 = memref.load %arg1[%c5] : memref<16xf32, #tpu.memory_space<smem>>
    %61 = vector.broadcast %60 : f32 to vector<8x128xf32>
    %62 = arith.subf %0, %61 : vector<8x128xf32>
    %c5_12 = arith.constant 5 : index
    %63 = memref.load %arg3[%c5_12] : memref<16xf32, #tpu.memory_space<smem>>
    %64 = arith.mulf %62, %62 : vector<8x128xf32>
    %c5_13 = arith.constant 5 : index
    %65 = memref.load %arg2[%c5_13] : memref<16xf32, #tpu.memory_space<smem>>
    %66 = vector.broadcast %65 : f32 to vector<8x128xf32>
    %67 = arith.mulf %64, %66 : vector<8x128xf32>
    %68 = math.exp %67 : vector<8x128xf32>
    %69 = vector.broadcast %63 : f32 to vector<8x128xf32>
    %70 = arith.mulf %69, %68 : vector<8x128xf32>
    %71 = arith.addf %59, %70 : vector<8x128xf32>
    %c6 = arith.constant 6 : index
    %72 = memref.load %arg1[%c6] : memref<16xf32, #tpu.memory_space<smem>>
    %73 = vector.broadcast %72 : f32 to vector<8x128xf32>
    %74 = arith.subf %0, %73 : vector<8x128xf32>
    %c6_14 = arith.constant 6 : index
    %75 = memref.load %arg3[%c6_14] : memref<16xf32, #tpu.memory_space<smem>>
    %76 = arith.mulf %74, %74 : vector<8x128xf32>
    %c6_15 = arith.constant 6 : index
    %77 = memref.load %arg2[%c6_15] : memref<16xf32, #tpu.memory_space<smem>>
    %78 = vector.broadcast %77 : f32 to vector<8x128xf32>
    %79 = arith.mulf %76, %78 : vector<8x128xf32>
    %80 = math.exp %79 : vector<8x128xf32>
    %81 = vector.broadcast %75 : f32 to vector<8x128xf32>
    %82 = arith.mulf %81, %80 : vector<8x128xf32>
    %83 = arith.addf %71, %82 : vector<8x128xf32>
    %c7 = arith.constant 7 : index
    %84 = memref.load %arg1[%c7] : memref<16xf32, #tpu.memory_space<smem>>
    %85 = vector.broadcast %84 : f32 to vector<8x128xf32>
    %86 = arith.subf %0, %85 : vector<8x128xf32>
    %c7_16 = arith.constant 7 : index
    %87 = memref.load %arg3[%c7_16] : memref<16xf32, #tpu.memory_space<smem>>
    %88 = arith.mulf %86, %86 : vector<8x128xf32>
    %c7_17 = arith.constant 7 : index
    %89 = memref.load %arg2[%c7_17] : memref<16xf32, #tpu.memory_space<smem>>
    %90 = vector.broadcast %89 : f32 to vector<8x128xf32>
    %91 = arith.mulf %88, %90 : vector<8x128xf32>
    %92 = math.exp %91 : vector<8x128xf32>
    %93 = vector.broadcast %87 : f32 to vector<8x128xf32>
    %94 = arith.mulf %93, %92 : vector<8x128xf32>
    %95 = arith.addf %83, %94 : vector<8x128xf32>
    %c8 = arith.constant 8 : index
    %96 = memref.load %arg1[%c8] : memref<16xf32, #tpu.memory_space<smem>>
    %97 = vector.broadcast %96 : f32 to vector<8x128xf32>
    %98 = arith.subf %0, %97 : vector<8x128xf32>
    %c8_18 = arith.constant 8 : index
    %99 = memref.load %arg3[%c8_18] : memref<16xf32, #tpu.memory_space<smem>>
    %100 = arith.mulf %98, %98 : vector<8x128xf32>
    %c8_19 = arith.constant 8 : index
    %101 = memref.load %arg2[%c8_19] : memref<16xf32, #tpu.memory_space<smem>>
    %102 = vector.broadcast %101 : f32 to vector<8x128xf32>
    %103 = arith.mulf %100, %102 : vector<8x128xf32>
    %104 = math.exp %103 : vector<8x128xf32>
    %105 = vector.broadcast %99 : f32 to vector<8x128xf32>
    %106 = arith.mulf %105, %104 : vector<8x128xf32>
    %107 = arith.addf %95, %106 : vector<8x128xf32>
    %c9 = arith.constant 9 : index
    %108 = memref.load %arg1[%c9] : memref<16xf32, #tpu.memory_space<smem>>
    %109 = vector.broadcast %108 : f32 to vector<8x128xf32>
    %110 = arith.subf %0, %109 : vector<8x128xf32>
    %c9_20 = arith.constant 9 : index
    %111 = memref.load %arg3[%c9_20] : memref<16xf32, #tpu.memory_space<smem>>
    %112 = arith.mulf %110, %110 : vector<8x128xf32>
    %c9_21 = arith.constant 9 : index
    %113 = memref.load %arg2[%c9_21] : memref<16xf32, #tpu.memory_space<smem>>
    %114 = vector.broadcast %113 : f32 to vector<8x128xf32>
    %115 = arith.mulf %112, %114 : vector<8x128xf32>
    %116 = math.exp %115 : vector<8x128xf32>
    %117 = vector.broadcast %111 : f32 to vector<8x128xf32>
    %118 = arith.mulf %117, %116 : vector<8x128xf32>
    %119 = arith.addf %107, %118 : vector<8x128xf32>
    %c10 = arith.constant 10 : index
    %120 = memref.load %arg1[%c10] : memref<16xf32, #tpu.memory_space<smem>>
    %121 = vector.broadcast %120 : f32 to vector<8x128xf32>
    %122 = arith.subf %0, %121 : vector<8x128xf32>
    %c10_22 = arith.constant 10 : index
    %123 = memref.load %arg3[%c10_22] : memref<16xf32, #tpu.memory_space<smem>>
    %124 = arith.mulf %122, %122 : vector<8x128xf32>
    %c10_23 = arith.constant 10 : index
    %125 = memref.load %arg2[%c10_23] : memref<16xf32, #tpu.memory_space<smem>>
    %126 = vector.broadcast %125 : f32 to vector<8x128xf32>
    %127 = arith.mulf %124, %126 : vector<8x128xf32>
    %128 = math.exp %127 : vector<8x128xf32>
    %129 = vector.broadcast %123 : f32 to vector<8x128xf32>
    %130 = arith.mulf %129, %128 : vector<8x128xf32>
    %131 = arith.addf %119, %130 : vector<8x128xf32>
    %c11 = arith.constant 11 : index
    %132 = memref.load %arg1[%c11] : memref<16xf32, #tpu.memory_space<smem>>
    %133 = vector.broadcast %132 : f32 to vector<8x128xf32>
    %134 = arith.subf %0, %133 : vector<8x128xf32>
    %c11_24 = arith.constant 11 : index
    %135 = memref.load %arg3[%c11_24] : memref<16xf32, #tpu.memory_space<smem>>
    %136 = arith.mulf %134, %134 : vector<8x128xf32>
    %c11_25 = arith.constant 11 : index
    %137 = memref.load %arg2[%c11_25] : memref<16xf32, #tpu.memory_space<smem>>
    %138 = vector.broadcast %137 : f32 to vector<8x128xf32>
    %139 = arith.mulf %136, %138 : vector<8x128xf32>
    %140 = math.exp %139 : vector<8x128xf32>
    %141 = vector.broadcast %135 : f32 to vector<8x128xf32>
    %142 = arith.mulf %141, %140 : vector<8x128xf32>
    %143 = arith.addf %131, %142 : vector<8x128xf32>
    %c12 = arith.constant 12 : index
    %144 = memref.load %arg1[%c12] : memref<16xf32, #tpu.memory_space<smem>>
    %145 = vector.broadcast %144 : f32 to vector<8x128xf32>
    %146 = arith.subf %0, %145 : vector<8x128xf32>
    %c12_26 = arith.constant 12 : index
    %147 = memref.load %arg3[%c12_26] : memref<16xf32, #tpu.memory_space<smem>>
    %148 = arith.mulf %146, %146 : vector<8x128xf32>
    %c12_27 = arith.constant 12 : index
    %149 = memref.load %arg2[%c12_27] : memref<16xf32, #tpu.memory_space<smem>>
    %150 = vector.broadcast %149 : f32 to vector<8x128xf32>
    %151 = arith.mulf %148, %150 : vector<8x128xf32>
    %152 = math.exp %151 : vector<8x128xf32>
    %153 = vector.broadcast %147 : f32 to vector<8x128xf32>
    %154 = arith.mulf %153, %152 : vector<8x128xf32>
    %155 = arith.addf %143, %154 : vector<8x128xf32>
    %c13 = arith.constant 13 : index
    %156 = memref.load %arg1[%c13] : memref<16xf32, #tpu.memory_space<smem>>
    %157 = vector.broadcast %156 : f32 to vector<8x128xf32>
    %158 = arith.subf %0, %157 : vector<8x128xf32>
    %c13_28 = arith.constant 13 : index
    %159 = memref.load %arg3[%c13_28] : memref<16xf32, #tpu.memory_space<smem>>
    %160 = arith.mulf %158, %158 : vector<8x128xf32>
    %c13_29 = arith.constant 13 : index
    %161 = memref.load %arg2[%c13_29] : memref<16xf32, #tpu.memory_space<smem>>
    %162 = vector.broadcast %161 : f32 to vector<8x128xf32>
    %163 = arith.mulf %160, %162 : vector<8x128xf32>
    %164 = math.exp %163 : vector<8x128xf32>
    %165 = vector.broadcast %159 : f32 to vector<8x128xf32>
    %166 = arith.mulf %165, %164 : vector<8x128xf32>
    %167 = arith.addf %155, %166 : vector<8x128xf32>
    %c14 = arith.constant 14 : index
    %168 = memref.load %arg1[%c14] : memref<16xf32, #tpu.memory_space<smem>>
    %169 = vector.broadcast %168 : f32 to vector<8x128xf32>
    %170 = arith.subf %0, %169 : vector<8x128xf32>
    %c14_30 = arith.constant 14 : index
    %171 = memref.load %arg3[%c14_30] : memref<16xf32, #tpu.memory_space<smem>>
    %172 = arith.mulf %170, %170 : vector<8x128xf32>
    %c14_31 = arith.constant 14 : index
    %173 = memref.load %arg2[%c14_31] : memref<16xf32, #tpu.memory_space<smem>>
    %174 = vector.broadcast %173 : f32 to vector<8x128xf32>
    %175 = arith.mulf %172, %174 : vector<8x128xf32>
    %176 = math.exp %175 : vector<8x128xf32>
    %177 = vector.broadcast %171 : f32 to vector<8x128xf32>
    %178 = arith.mulf %177, %176 : vector<8x128xf32>
    %179 = arith.addf %167, %178 : vector<8x128xf32>
    %c15 = arith.constant 15 : index
    %180 = memref.load %arg1[%c15] : memref<16xf32, #tpu.memory_space<smem>>
    %181 = vector.broadcast %180 : f32 to vector<8x128xf32>
    %182 = arith.subf %0, %181 : vector<8x128xf32>
    %c15_32 = arith.constant 15 : index
    %183 = memref.load %arg3[%c15_32] : memref<16xf32, #tpu.memory_space<smem>>
    %184 = arith.mulf %182, %182 : vector<8x128xf32>
    %c15_33 = arith.constant 15 : index
    %185 = memref.load %arg2[%c15_33] : memref<16xf32, #tpu.memory_space<smem>>
    %186 = vector.broadcast %185 : f32 to vector<8x128xf32>
    %187 = arith.mulf %184, %186 : vector<8x128xf32>
    %188 = math.exp %187 : vector<8x128xf32>
    %189 = vector.broadcast %183 : f32 to vector<8x128xf32>
    %190 = arith.mulf %189, %188 : vector<8x128xf32>
    %191 = arith.addf %179, %190 : vector<8x128xf32>
    %c0_34 = arith.constant 0 : index
    %c0_35 = arith.constant 0 : index
    %192 = vector.load %arg5[%c0_34, %c0_35] : memref<8x128xf32, #tpu.memory_space<vmem>>, vector<8x128xf32>
    tpu.vector_store %arg5[%c0_34, %c0_35], %191 {strides = array<i32>} : memref<8x128xf32, #tpu.memory_space<vmem>>, vector<8x128xf32>,
    return
  }
  func.func @transform_0(%arg0: i32) -> i32 {
    %c0_i32 = arith.constant 0 : i32
    %c0_i32_0 = arith.constant 0 : i32
    return %c0_i32 : i32
  }
  func.func @transform_1(%arg0: i32) -> i32 {
    %c0_i32 = arith.constant 0 : i32
    %c0_i32_0 = arith.constant 0 : i32
    return %c0_i32 : i32
  }
  func.func @transform_2(%arg0: i32) -> i32 {
    %c0_i32 = arith.constant 0 : i32
    %c0_i32_0 = arith.constant 0 : i32
    return %c0_i32 : i32
  }
  func.func @transform_3(%arg0: i32) -> (i32, i32) {
    %c0_i32 = arith.constant 0 : i32
    %c0_i32_0 = arith.constant 0 : i32
    return %arg0, %c0_i32 : i32, i32
  }
  func.func @transform_4(%arg0: i32) -> (i32, i32) {
    %c0_i32 = arith.constant 0 : i32
    %c0_i32_0 = arith.constant 0 : i32
    return %arg0, %c0_i32 : i32, i32
  }
}

</mosaic_0001>

<bundles_post_ra>
// kernel: tpu_custom_call.1
= control target key start
LH: loop header
LB: loop body
LE: loop exit
PB: predicated region body
PF: predicated region fallthrough
CT: control target
= control target key end

     0   :  { %9 = vsyncpa [#allocation4], 0  ;;  %s623_s0 = inlined_call_operand.hbm [shape: f32[16], index: 0, kind: input, shape index: {}]   ;;  %s624_s1 = inlined_call_operand.vmem [shape: f32[16], index: 1, kind: input, shape index: {}]   ;;  %s625_s2 = inlined_call_operand.vmem [shape: f32[16], index: 2, kind: input, shape index: {}]   ;;  %s626_s3 = inlined_call_operand.vmem [shape: f32[8,128], index: 3, kind: input, shape index: {}]   ;;  %s627_s4 = inlined_call_operand.hbm [shape: f32[8,128], index: 4, kind: output, shape index: {}]  }
   0x1   :  { %10 = vsyncpa [#allocation5], 0 }
   0x2   :  { %11 = vsyncpa [#allocation8], 0 }
   0x3   :  { %12 = vsyncpa [#allocation3], 0  ;;  %s27_s17 = sshll.u32 %s624_s1, 4  ;;  %s360_s20 = scalar_lea.hbm %s623_s0, 16  ;;  %s28_s17 = int_to_ptr.vmem [resolvable:$true] %s27_s17 }
   0x4   :  { %p361_p0 = scmp.ne.s32.totalorder %s623_s0, %s360_s20  ;;  %p364_p1 = scmp.lt.u32.totalorder %s360_s20, %s623_s0 }
   0x6   :  { %p366_p2 = pnand %p364_p1, %p361_p0 }
   0x8   :  { %369 = shalt.err (!%p366_p2)
}
   0x9   :  { %s424_s25 = smov [#allocation2]   ;;  %s370_s1 = scalar_lea.vmem %s28_s17, 16 }
   0xa   :  { %20 = dma.hbm_to_smem %s623_s0, 16, %s424_s25, [#allocation4]  }
   0xb   :  { %p371_p3 = scmp.ne.s32.totalorder %s28_s17, %s370_s1  ;;  %p375_p4 = scmp.lt.s32.totalorder %s28_s17, %s28_s17 }
   0xc   :  { %p376_p5 = scmp.lt.s32.totalorder %s370_s1, %s370_s1 }
   0xe   :  { %p377_p6 = por %p376_p5, %p375_p4 }
  0x10   :  { %p378_p7 = pnand %p377_p6, %p371_p3 }
  0x12   :  { %381 = shalt.err (!%p378_p7)
}
  0x13   :  { %s425_s28 = smov [#allocation6]   ;;  %s37_s5 = sshll.u32 %s625_s2, 4  ;;  %s38_s5 = int_to_ptr.vmem [resolvable:$true] %s37_s5 }
  0x14   :  { %30 = dma.vmem_to_smem %s28_s17, 16, %s425_s28, [#allocation5]  }
  0x15   :  { %s382_s6 = scalar_lea.vmem %s38_s5, 16  ;;  %p387_p9 = scmp.lt.s32.totalorder %s38_s5, %s38_s5 }
  0x16   :  { %p383_p8 = scmp.ne.s32.totalorder %s38_s5, %s382_s6  ;;  %p388_p10 = scmp.lt.s32.totalorder %s382_s6, %s382_s6 }
  0x18   :  { %p389_p11 = por %p388_p10, %p387_p9 }
  0x1a   :  { %p390_p12 = pnand %p389_p11, %p383_p8 }
  0x1c   :  { %393 = shalt.err (!%p390_p12)
}
  0x1d   :  { %s426_s0 = smov [#allocation7]  }
  0x1e   :  { %40 = dma.vmem_to_smem %s38_s5, 16, %s426_s0, [#allocation8]  }
  0x1f   :  { %416 = dma.done.wait [#allocation4], 16  }
  0x20   :  { %417 = vsyncadd [#allocation4], 4294967280 }
  0x21   :  { %418 = dma.done.wait [#allocation5], 16  }
  0x22   :  { %419 = vsyncadd [#allocation5], 4294967280 }
  0x23   :  { %420 = dma.done.wait [#allocation8], 16  }
  0x24   :  { %421 = vsyncadd [#allocation8], 4294967280 }
  0x25   :  { %52 = sfence }
  0x26   :  { %s54_s7 = sld [smem:[#allocation2]]  ;;  %s279_s2 = sld [smem:[#allocation2 + $0x1]]  ;;  %v474_v0 = vld [vmem:[%s626_s3] sm:$0xff] }
  0x27   :  { %s59_s8 = sld [smem:[#allocation6]]  ;;  %s281_s9 = sld [smem:[#allocation6 + $0x1]] }
  0x28   :  { %s282_s10 = sld [smem:[#allocation2 + $0x2]]  ;;  %s285_s14 = sld [smem:[#allocation2 + $0x3]] }
  0x29   :  { %s476_s13 = sld [smem:[#allocation6 + $0x2]]  ;;  %s478_s15 = sld [smem:[#allocation7]] }
  0x2a   :  { %s480_s16 = sld [smem:[#allocation6 + $0x3]]  ;;  %s482_s17 = sld [smem:[#allocation2 + $0x4]] }
  0x2b   :  { %s485_s18 = sld [smem:[#allocation6 + $0x4]]  ;;  %s487_s19 = sld [smem:[#allocation2 + $0x5]] }
  0x2c   :  { %v55_v1 = vstv %s54_s7  ;;  %v67_v3 = vstv %s279_s2  ;;  %s490_s3 = sld [smem:[#allocation6 + $0x5]]  ;;  %s492_s20 = sld [smem:[#allocation7 + $0x1]] }
  0x2d   :  { %v56_v2 = vsub.f32 %v474_v0, %v55_v1  ;;  %v60_v4 = vstv %s59_s8  ;;  %v68_v5 = vsub.f32 %v474_v0, %v67_v3  ;;  %v72_v7 = vstv %s281_s9  ;;  %s494_s21 = sld [smem:[#allocation2 + $0x6]]  ;;  %s499_s23 = sld [smem:[#allocation2 + $0x7]] }
  0x2e   :  { %v80_v8 = vstv %s282_s10  ;;  %v93_v11 = vstv %s285_s14  ;;  %s497_s22 = sld [smem:[#allocation6 + $0x6]]  ;;  %s501_s24 = sld [smem:[#allocation7 + $0x2]] }
  0x2f   :  { %v58_v6 = vmul.f32 %v56_v2, %v56_v2  ;;  %v70_v9 = vmul.f32 %v68_v5, %v68_v5  ;;  %v81_v10 = vsub.f32 %v474_v0, %v80_v8  ;;  %v85_v13 = vstv %s476_s13  ;;  %s507_s25 = sld [smem:[#allocation6 + $0x7]]  ;;  %s509_s26 = sld [smem:[#allocation2 + $0x8]] }
  0x30   :  { %v94_v14 = vsub.f32 %v474_v0, %v93_v11  ;;  %v98_v17 = vstv %s480_s16  ;;  %v106_v18 = vstv %s482_s17  ;;  %v64_v20 = vstv %s478_s15  ;;  %s512_s27 = sld [smem:[#allocation7 + $0x3]]  ;;  %s517_s1 = sld [smem:[#allocation6 + $0x8]] }
  0x31   :  { %v61_v12 = vmul.f32 %v60_v4, %v58_v6  ;;  %v73_v15 = vmul.f32 %v72_v7, %v70_v9  ;;  %v83_v16 = vmul.f32 %v81_v10, %v81_v10  ;;  %v107_v22 = vsub.f32 %v474_v0, %v106_v18  ;;  %s519_s28 = sld [smem:[#allocation2 + $0x9]]  ;;  %s521_s29 = sld [smem:[#allocation7 + $0x4]] }
  0x32   :  { %v96_v21 = vmul.f32 %v94_v14, %v94_v14  ;;  %v111_v25 = vstv %s485_s18  ;;  %v119_v26 = vstv %s487_s19  ;;  %v124_v31 = vstv %s490_s3  ;;  %s526_s30 = sld [smem:[#allocation6 + $0x9]]  ;;  %s528_s5 = sld [smem:[#allocation2 + $0xa]] }
  0x33   :  { %v62_v19 = vmul.f32 1.442695, %v61_v12  ;;  %v74_v23 = vmul.f32 1.442695, %v73_v15  ;;  %v86_v24 = vmul.f32 %v85_v13, %v83_v16  ;;  %v109_v28 = vmul.f32 %v107_v22, %v107_v22  ;;  %s532_s6 = sld [smem:[#allocation7 + $0x5]]  ;;  %s536_s0 = sld [smem:[#allocation6 + $0xa]] }
  0x34   :  { %v99_v27 = vmul.f32 %v98_v17, %v96_v21  ;;  %v120_v29 = vsub.f32 %v474_v0, %v119_v26  ;;  %v132_v32 = vstv %s494_s21  ;;  %v76_v37 = vstv %s492_s20  ;;  %s538_s7 = sld [smem:[#allocation7 + $0x6]]  ;;  %s542_s8 = sld [smem:[#allocation7 + $0x7]] }
  0x35   :  { %328 = vpow2.f32 %v62_v19  ;;  %v87_v30 = vmul.f32 1.442695, %v86_v24  ;;  %v112_v34 = vmul.f32 %v111_v25, %v109_v28  ;;  %v133_v36 = vsub.f32 %v474_v0, %v132_v32  ;;  %s546_s2 = sld [smem:[#allocation2 + $0xb]]  ;;  %s552_s9 = sld [smem:[#allocation2 + $0xc]] }
  0x36   :  { %330 = vpow2.f32 %v74_v23  ;;  %v100_v33 = vmul.f32 1.442695, %v99_v27  ;;  %v122_v35 = vmul.f32 %v120_v29, %v120_v29  ;;  %v137_v38 = vstv %s497_s22  ;;  %s555_s10 = sld [smem:[#allocation6 + $0xb]]  ;;  %s560_s11 = sld [smem:[#allocation6 + $0xc]] }
  0x37   :  { %332 = vpow2.f32 %v87_v30  ;;  %v145_v39 = vstv %s499_s23  ;;  %v113_v40 = vmul.f32 1.442695, %v112_v34  ;;  %v135_v42 = vmul.f32 %v133_v36, %v133_v36  ;;  %s562_s12 = sld [smem:[#allocation7 + $0x8]]  ;;  %s565_s13 = sld [smem:[#allocation2 + $0xd]] }
  0x38   :  { %334 = vpow2.f32 %v100_v33  ;;  %v125_v41 = vmul.f32 %v124_v31, %v122_v35  ;;  %v89_v43 = vstv %s501_s24  ;;  %v146_v44 = vsub.f32 %v474_v0, %v145_v39  ;;  %s571_s14 = sld [smem:[#allocation6 + $0xd]]  ;;  %s573_s16 = sld [smem:[#allocation2 + $0xe]] }
  0x39   :  { %v150_v45 = vstv %s507_s25  ;;  %v158_v46 = vstv %s509_s26  ;;  %336 = vpow2.f32 %v113_v40  ;;  %v138_v48 = vmul.f32 %v137_v38, %v135_v42  ;;  %s578_s15 = sld [smem:[#allocation7 + $0x9]]  ;;  %s580_s17 = sld [smem:[#allocation6 + $0xe]] }
  0x3a   :  { %v126_v47 = vmul.f32 1.442695, %v125_v41  ;;  %v159_v49 = vsub.f32 %v474_v0, %v158_v46  ;;  %v102_v50 = vstv %s512_s27  ;;  %v148_v51 = vmul.f32 %v146_v44, %v146_v44  ;;  %s584_s18 = sld [smem:[#allocation2 + $0xf]]  ;;  %s593_s3 = sld [smem:[#allocation7 + $0xa]] }
  0x3b   :  { %v163_v52 = vstv %s517_s1  ;;  %v171_v53 = vstv %s519_s28  ;;  %v139_v54 = vmul.f32 1.442695, %v138_v48  ;;  %v115_v57 = vstv %s521_s29  ;;  %s589_s19 = sld [smem:[#allocation6 + $0xf]]  ;;  %s601_s20 = sld [smem:[#allocation7 + $0xb]] }
  0x3c   :  { %338 = vpow2.f32 %v126_v47  ;;  %v161_v55 = vmul.f32 %v159_v49, %v159_v49  ;;  %v172_v56 = vsub.f32 %v474_v0, %v171_v53  ;;  %v151_v58 = vmul.f32 %v150_v45, %v148_v51  ;;  %s604_s21 = sld [smem:[#allocation7 + $0xc]]  ;;  %s316_s22 = sld [smem:[#allocation7 + $0xd]] }
  0x3d   :  { %v176_v59 = vstv %s526_s30  ;;  %v184_v60 = vstv %s528_s5  ;;  %340 = vpow2.f32 %v139_v54  ;;  %v128_v4 = vstv %s532_s6  ;;  %s319_s23 = sld [smem:[#allocation7 + $0xe]]  ;;  %s322_s24 = sld [smem:[#allocation7 + $0xf]] }
  0x3e   :  { %v164_v62 = vmul.f32 %v163_v52, %v161_v55  ;;  %v174_v63 = vmul.f32 %v172_v56, %v172_v56  ;;  %v185_v1 = vsub.f32 %v474_v0, %v184_v60  ;;  %v152_v5 = vmul.f32 1.442695, %v151_v58  ;;  %s427_s25 = smov [#allocation9]  }
  0x3f   :  { %v329_v61 = vpop.eup %328  ;;  %v189_v6 = vstv %s536_s0  ;;  %v141_v12 = vstv %s538_s7  ;;  %v154_v13 = vstv %s542_s8  ;;  %v197_v14 = vstv %s546_s2  ;;  %s268_s26 = sshll.u32 %s427_s25, 4  ;;  %s269_s26 = int_to_ptr.vmem [resolvable:$true] %s268_s26 }
  0x40   :  { %v331_v2 = vpop.eup %330  ;;  %v65_v3 = vmul.f32 %v329_v61, %v64_v20  ;;  %v165_v8 = vmul.f32 1.442695, %v164_v62  ;;  %v177_v9 = vmul.f32 %v176_v59, %v174_v63  ;;  %v187_v10 = vmul.f32 %v185_v1, %v185_v1  ;;  %s394_s27 = scalar_lea.vmem %s269_s26, 128  ;;  %p399_p0 = scmp.lt.s32.totalorder %s269_s26, %s269_s26 }
  0x41   :  { %v77_v7 = vmul.f32 %v331_v2, %v76_v37  ;;  %v333_v11 = vpop.eup %332  ;;  %342 = vpow2.f32 %v152_v5  ;;  %v198_v21 = vsub.f32 %v474_v0, %v197_v14  ;;  %v210_v22 = vstv %s552_s9  ;;  %p395_p13 = scmp.ne.s32.totalorder %s269_s26, %s394_s27  ;;  %p400_p1 = scmp.lt.s32.totalorder %s394_s27, %s394_s27 }
  0x42   :  { %v335_v15 = vpop.eup %334  ;;  %v90_v17 = vmul.f32 %v333_v11, %v89_v43  ;;  %344 = vpow2.f32 %v165_v8  ;;  %v178_v18 = vmul.f32 1.442695, %v177_v9  ;;  %v190_v20 = vmul.f32 %v189_v6, %v187_v10 }
  0x43   :  { %v78_v16 = vadd.f32 %v77_v7, %v65_v3  ;;  %v103_v19 = vmul.f32 %v335_v15, %v102_v50  ;;  %v337_v23 = vpop.eup %336  ;;  %v202_v25 = vstv %s555_s10  ;;  %v211_v26 = vsub.f32 %v474_v0, %v210_v22  ;;  %p401_p2 = por %p400_p1, %p399_p0 }
  0x44   :  { %346 = vpow2.f32 %v178_v18  ;;  %v116_v27 = vmul.f32 %v337_v23, %v115_v57  ;;  %v191_v28 = vmul.f32 1.442695, %v190_v20  ;;  %v200_v29 = vmul.f32 %v198_v21, %v198_v21 }
  0x45   :  { %v91_v24 = vadd.f32 %v90_v17, %v78_v16  ;;  %v215_v30 = vstv %s560_s11  ;;  %v167_v33 = vstv %s562_s12  ;;  %v213_v34 = vmul.f32 %v211_v26, %v211_v26  ;;  %p402_p3 = pnand %p401_p2, %p395_p13 }
  0x46   :  { %v339_v31 = vpop.eup %338  ;;  %v223_v35 = vstv %s565_s13  ;;  %348 = vpow2.f32 %v191_v28  ;;  %v203_v37 = vmul.f32 %v202_v25, %v200_v29  ;;  %v228_v42 = vstv %s571_s14 }
  0x47   :  { %v104_v32 = vadd.f32 %v103_v19, %v91_v24  ;;  %v129_v36 = vmul.f32 %v339_v31, %v128_v4  ;;  %v224_v38 = vsub.f32 %v474_v0, %v223_v35  ;;  %v341_v39 = vpop.eup %340  ;;  %v216_v41 = vmul.f32 %v215_v30, %v213_v34 }
  0x48   :  { %v236_v43 = vstv %s573_s16  ;;  %v142_v44 = vmul.f32 %v341_v39, %v141_v12  ;;  %v204_v45 = vmul.f32 1.442695, %v203_v37  ;;  %v180_v49 = vstv %s578_s15 }
  0x49   :  { %v117_v40 = vadd.f32 %v116_v27, %v104_v32  ;;  %v226_v46 = vmul.f32 %v224_v38, %v224_v38  ;;  %v237_v47 = vsub.f32 %v474_v0, %v236_v43  ;;  %v217_v50 = vmul.f32 1.442695, %v216_v41 }
  0x4a   :  { %v241_v51 = vstv %s580_s17  ;;  %350 = vpow2.f32 %v204_v45  ;;  %v249_v55 = vstv %s584_s18  ;;  %v254_v63 = vstv %s589_s19 }
  0x4b   :  { %v130_v48 = vadd.f32 %v129_v36, %v117_v40  ;;  %v343_v52 = vpop.eup %342  ;;  %v229_v53 = vmul.f32 %v228_v42, %v226_v46  ;;  %v239_v54 = vmul.f32 %v237_v47, %v237_v47  ;;  %352 = vpow2.f32 %v217_v50 }
  0x4c   :  { %v345_v56 = vpop.eup %344  ;;  %v155_v58 = vmul.f32 %v343_v52, %v154_v13  ;;  %v250_v59 = vsub.f32 %v474_v0, %v249_v55  ;;  %v193_v5 = vstv %s593_s3  ;;  %v206_v12 = vstv %s601_s20 }
  0x4d   :  { %v143_v57 = vadd.f32 %v142_v44, %v130_v48  ;;  %v168_v60 = vmul.f32 %v345_v56, %v167_v33  ;;  %v230_v61 = vmul.f32 1.442695, %v229_v53  ;;  %v242_v62 = vmul.f32 %v241_v51, %v239_v54 }
  0x4e   :  { %v347_v1 = vpop.eup %346  ;;  %v252_v3 = vmul.f32 %v250_v59, %v250_v59  ;;  %v219_v14 = vstv %s604_s21  ;;  %v232_v19 = vstv %s316_s22  ;;  %v245_v22 = vstv %s319_s23 }
  0x4f   :  { %v156_v2 = vadd.f32 %v155_v58, %v143_v57  ;;  %v181_v4 = vmul.f32 %v347_v1, %v180_v49  ;;  %354 = vpow2.f32 %v230_v61  ;;  %v243_v6 = vmul.f32 1.442695, %v242_v62 }
  0x50   :  { %v255_v8 = vmul.f32 %v254_v63, %v252_v3  ;;  %v349_v9 = vpop.eup %348  ;;  %v258_v28 = vstv %s322_s24 }
  0x51   :  { %v169_v7 = vadd.f32 %v168_v60, %v156_v2  ;;  %356 = vpow2.f32 %v243_v6  ;;  %v194_v10 = vmul.f32 %v349_v9, %v193_v5 }
  0x52   :  { %v256_v11 = vmul.f32 1.442695, %v255_v8 }
  0x53   :  { %v182_v0 = vadd.f32 %v181_v4, %v169_v7 }
  0x54   :  { %358 = vpow2.f32 %v256_v11  ;;  %v351_v15 = vpop.eup %350 }
  0x55   :  { %v195_v13 = vadd.f32 %v194_v10, %v182_v0  ;;  %v353_v16 = vpop.eup %352  ;;  %v207_v17 = vmul.f32 %v351_v15, %v206_v12 }
  0x56   :  { %v220_v18 = vmul.f32 %v353_v16, %v219_v14 }
  0x57   :  { %v208_v20 = vadd.f32 %v207_v17, %v195_v13 }
  0x59   :  { %v355_v21 = vpop.eup %354  ;;  %v221_v23 = vadd.f32 %v220_v18, %v208_v20 }
  0x5a   :  { %v233_v24 = vmul.f32 %v355_v21, %v232_v19 }
  0x5b   :  { %v357_v25 = vpop.eup %356 }
  0x5c   :  { %v234_v26 = vadd.f32 %v233_v24, %v221_v23  ;;  %v246_v27 = vmul.f32 %v357_v25, %v245_v22 }
  0x5e   :  { %v359_v29 = vpop.eup %358  ;;  %v247_v30 = vadd.f32 %v246_v27, %v234_v26 }
  0x5f   :  { %v259_v31 = vmul.f32 %v359_v29, %v258_v28 }
  0x61   :  { %v260_v32 = vadd.f32 %v259_v31, %v247_v30 }
  0x63   :  { %261 = vst [vmem:[#allocation9] sm:$0xff] %v260_v32 }
  0x64   :  { %405 = shalt.err (!%p402_p3)
}
  0x65   :  { %s406_s29 = scalar_lea.hbm %s627_s4, 128 }
  0x66   :  { %p407_p4 = scmp.ne.s32.totalorder %s627_s4, %s406_s29  ;;  %p410_p5 = scmp.lt.u32.totalorder %s406_s29, %s627_s4 }
  0x68   :  { %p412_p6 = pnand %p410_p5, %p407_p4 }
  0x6a   :  { %415 = shalt.err (!%p412_p6)
}
  0x6b   :  { %271 = dma.vmem_to_hbm [thread:$0]  %s269_s26, 128, %s627_s4, [#allocation3]  }
  0x6c   :  { %422 = dma.done.wait [#allocation3], 128  }
  0x6d   :  { %423 = vsyncadd [#allocation3], 4294967168 }
  0x6e   :  { %275 = vsyncpa [#allocation3], 1 }
  0x6f   :  { %276 = vsyncpa [#allocation4], 1 }
  0x70   :  { %277 = vsyncpa [#allocation5], 1 }
  0x71   :  { %278 = vsyncpa [#allocation8], 1 }

</bundles_post_ra>
